<compile_context>
chip_gen: v6e
topology: v6e:2x2x1
jax: 0.10.0
libtpu: 0.0.40
codegen_flags: <defaults>
</compile_context>

<pallas_src>
import math

import jax
import jax.numpy as jnp
from jax.experimental import pallas as pl
from jax.experimental.pallas import tpu as pltpu


def get_sinusoid_encoding_table(n_position: int, d_hid: int) -> jnp.ndarray:
    """Deterministic frozen buffer, same math as the PyTorch reference (even d_hid)."""
    position = jnp.arange(n_position, dtype=jnp.float32)[:, None]             # (P, 1)
    div_term = jnp.exp(
        jnp.arange(0, d_hid, 2, dtype=jnp.float32) * (-math.log(10000.0) / d_hid)
    )                                                                          # (D/2,)
    angles = position * div_term                                               # (P, D/2)
    table = jnp.zeros((n_position, d_hid), dtype=jnp.float32)
    table = table.at[:, 0::2].set(jnp.sin(angles))
    table = table.at[:, 1::2].set(jnp.cos(angles))
    return table


def _round_up(x: int, m: int) -> int:
    return (x + m - 1) // m * m


def _choose_tile_rows(rows: int, max_rows: int) -> int:
    """Pick a row tile: full extent if it fits, else a sublane-aligned divisor of
    `rows` (no padding, no post-slice), else fall back to max_rows (pad + slice)."""
    if rows <= max_rows:
        return rows
    for t in range(max_rows - max_rows % 8, 7, -8):
        if rows % t == 0:
            return t
    return max_rows


def _sincos_kernel(ids_ref, div_ref, out_ref):
    """One grid step = one tile of packed output rows.

    ids_ref : VMEM (tile_rows, pack) int32 -- `pack` position ids per output row
    div_ref : VMEM (1, W) float32          -- div_term value for every output lane
    out_ref : VMEM (tile_rows, W) float32  -- W = pack * D, lane-dense output slab
    """
    tile_rows, w = out_ref.shape
    pack = ids_ref.shape[1]
    d = w // pack

    ids_f = ids_ref[...].astype(jnp.float32)                          # (T, pack)
    col = jax.lax.broadcasted_iota(jnp.int32, (tile_rows, w), 1)      # lane index

    if pack == 1:
        pos = ids_f                                                   # (T, 1) -> broadcasts
    else:
        # Expand id k of each row over its D consecutive lanes with a static
        # (pack-1)-deep select chain: exact, VPU-only, no matmul / no gather.
        pos = jnp.broadcast_to(ids_f[:, pack - 1:pack], (tile_rows, w))
        for k in range(pack - 2, -1, -1):
            pos = jnp.where(
                col < (k + 1) * d,
                jnp.broadcast_to(ids_f[:, k:k + 1], (tile_rows, w)),
                pos,
            )

    angle = pos * div_ref[...]                                        # (T, W) on the VPU
    is_odd = (col & 1) == 1                                           # odd embed dim -> cos
    out_ref[...] = jnp.where(is_odd, jnp.cos(angle), jnp.sin(angle)).astype(out_ref.dtype)


def sinusoidal_position_encoding(position_ids: jnp.ndarray,
                                 max_position: int,
                                 d_hid: int) -> jnp.ndarray:
    """Pallas equivalent of SinusoidalPositionEncoding(max_position, d_hid)(position_ids)."""
    assert d_hid % 2 == 0, "sinusoidal table requires an even embedding size"
    orig_shape = position_ids.shape

    # Guard against out-of-range ids before they reach the kernel.
    ids = jnp.clip(position_ids.reshape(-1).astype(jnp.int32), 0, max_position - 1)
    n = ids.shape[0]

    # ---- lane packing: make the output last dim a multiple of 128 when D is small.
    if d_hid % 128 == 0:
        pack = 1
    elif 128 % d_hid == 0:
        pack = 128 // d_hid
    else:
        pack = 1  # TODO(synk): D neither divides nor is a multiple of 128 -> masked stores.
    w = pack * d_hid

    n_pos = _round_up(n, pack)
    if n_pos != n:
        ids = jnp.pad(ids, (0, n_pos - n))
    rows = n_pos // pack

    # ---- generation-aware row tile (v7x has 64 MiB/TC VMEM vs 128 MiB on v5e/v6e).
    try:
        vmem_cap = pltpu.get_tpu_info().vmem_capacity_bytes
    except Exception:  # pragma: no cover - conservative fallback (v7x-sized)
        vmem_cap = 64 * 1024 * 1024
    per_row_bytes = 2 * (w + pack) * 4          # double-buffered out + ids tiles, per row
    budget = vmem_cap // 16                     # stay far below every gen's scoped default
    max_tile_rows = max(8, min(2048, (budget // per_row_bytes) // 8 * 8))

    tile_rows = _choose_tile_rows(rows, max_tile_rows)
    rows_pad = _round_up(rows, tile_rows)
    if rows_pad != rows:
        ids = jnp.pad(ids, (0, (rows_pad - rows) * pack))
    ids2d = ids.reshape(rows_pad, pack)

    # Tiny (1, W) lane table of div_term values; same floats as the frozen torch buffer.
    div_term = jnp.exp(
        jnp.arange(0, d_hid, 2, dtype=jnp.float32) * (-math.log(10000.0) / d_hid)
    )
    div_row = jnp.tile(jnp.repeat(div_term, 2), pack).reshape(1, w)

    out = pl.pallas_call(
        _sincos_kernel,
        out_shape=jax.ShapeDtypeStruct((rows_pad, w), jnp.float32),
        grid=(rows_pad // tile_rows,),
        in_specs=[
            pl.BlockSpec((tile_rows, pack), lambda i: (i, 0)),   # per-tile ids
            pl.BlockSpec((1, w), lambda i: (0, 0)),              # 512 B, constant block
        ],
        out_specs=pl.BlockSpec((tile_rows, w), lambda i: (i, 0)),
        compiler_params=pltpu.CompilerParams(dimension_semantics=("parallel",)),
    )(ids2d, div_row)

    flat = out.reshape(-1)
    if rows_pad * pack != n:          # only when padding was unavoidable
        flat = flat[: n * d_hid]
    return flat.reshape(*orig_shape, d_hid)


if __name__ == "__main__":
    MAX_POSITION = 64
    EMBED_SIZE = 32
    BATCH, SEQ = 2, 8

    key = jax.random.PRNGKey(0)
    position_ids = jax.random.randint(key, (BATCH, SEQ), 0, MAX_POSITION, dtype=jnp.int32)

    out = sinusoidal_position_encoding(position_ids, MAX_POSITION, EMBED_SIZE)
    out = jax.block_until_ready(out)

    # Reference: frozen table lookup, identical to the torch module's forward.
    table = get_sinusoid_encoding_table(MAX_POSITION, EMBED_SIZE)
    ref = jnp.take(table, position_ids, axis=0)

    assert out.shape == (BATCH, SEQ, EMBED_SIZE), out.shape
    assert out.dtype == jnp.float32
    # In-kernel sin/cos (Mosaic lowering) may differ from XLA's by a few ulps after
    # range reduction; 1e-4 abs still catches any indexing/interleaving bug (values are O(1)).
    assert bool(jnp.allclose(out, ref, atol=1e-4, rtol=0.0)), \
        f"max abs err {float(jnp.max(jnp.abs(out - ref)))}"
    print("KERNEL_OK")
</pallas_src>

<mosaic_0001>
module attributes {stable_mosaic.version = 11 : i64} {
  func.func @_sincos_kernel(%arg0: i32, %arg1: memref<4x4xi32, #tpu.memory_space<vmem>>, %arg2: memref<1x128xf32, #tpu.memory_space<vmem>>, %arg3: memref<4x128xf32, #tpu.memory_space<vmem>>) attributes {dimension_semantics = [#tpu.dimension_semantics<parallel>], iteration_bounds = array<i64: 1>, scalar_prefetch = 0 : i64, scratch_operands = 0 : i64, tpu.core_type = #tpu.core_type<tc>, window_params = [{transform_indices = @transform_0, window_bounds = array<i64: 4, 4>}, {pipeline_mode = #tpu.pipeline_mode<synchronous>, transform_indices = @transform_1, window_bounds = array<i64: 1, 128>}, {transform_indices = @transform_2, window_bounds = array<i64: 4, 128>}]} {
    %c0 = arith.constant 0 : index
    %c0_0 = arith.constant 0 : index
    %0 = vector.load %arg1[%c0, %c0_0] : memref<4x4xi32, #tpu.memory_space<vmem>>, vector<4x4xi32>
    %1 = arith.sitofp %0 : vector<4x4xi32> to vector<4x4xf32>
    %2 = tpu.iota {dimensions = array<i32: 1>} : vector<4x128xi32>
    %3 = vector.extract_strided_slice %1 {offsets = [0, 3], sizes = [4, 1], strides = [1, 1]} : vector<4x4xf32> to vector<4x1xf32>
    %4 = vector.shape_cast %3 : vector<4x1xf32> to vector<4x1xf32>
    %5 = vector.broadcast %4 : vector<4x1xf32> to vector<4x128xf32>
    %c96_i32 = arith.constant 96 : i32
    %6 = vector.broadcast %c96_i32 : i32 to vector<4x128xi32>
    %7 = arith.cmpi slt, %2, %6 : vector<4x128xi32>
    %8 = vector.extract_strided_slice %1 {offsets = [0, 2], sizes = [4, 1], strides = [1, 1]} : vector<4x4xf32> to vector<4x1xf32>
    %9 = vector.shape_cast %8 : vector<4x1xf32> to vector<4x1xf32>
    %10 = vector.broadcast %9 : vector<4x1xf32> to vector<4x128xf32>
    %11 = arith.select %7, %10, %5 : vector<4x128xi1>, vector<4x128xf32>
    %c64_i32 = arith.constant 64 : i32
    %12 = vector.broadcast %c64_i32 : i32 to vector<4x128xi32>
    %13 = arith.cmpi slt, %2, %12 : vector<4x128xi32>
    %14 = vector.extract_strided_slice %1 {offsets = [0, 1], sizes = [4, 1], strides = [1, 1]} : vector<4x4xf32> to vector<4x1xf32>
    %15 = vector.shape_cast %14 : vector<4x1xf32> to vector<4x1xf32>
    %16 = vector.broadcast %15 : vector<4x1xf32> to vector<4x128xf32>
    %17 = arith.select %13, %16, %11 : vector<4x128xi1>, vector<4x128xf32>
    %c32_i32 = arith.constant 32 : i32
    %18 = vector.broadcast %c32_i32 : i32 to vector<4x128xi32>
    %19 = arith.cmpi slt, %2, %18 : vector<4x128xi32>
    %20 = vector.extract_strided_slice %1 {offsets = [0, 0], sizes = [4, 1], strides = [1, 1]} : vector<4x4xf32> to vector<4x1xf32>
    %21 = vector.shape_cast %20 : vector<4x1xf32> to vector<4x1xf32>
    %22 = vector.broadcast %21 : vector<4x1xf32> to vector<4x128xf32>
    %23 = arith.select %19, %22, %17 : vector<4x128xi1>, vector<4x128xf32>
    %c0_1 = arith.constant 0 : index
    %c0_2 = arith.constant 0 : index
    %24 = vector.load %arg2[%c0_1, %c0_2] : memref<1x128xf32, #tpu.memory_space<vmem>>, vector<1x128xf32>
    %25 = vector.broadcast %24 : vector<1x128xf32> to vector<4x128xf32>
    %26 = arith.mulf %23, %25 : vector<4x128xf32>
    %c1_i32 = arith.constant 1 : i32
    %27 = vector.broadcast %c1_i32 : i32 to vector<4x128xi32>
    %28 = arith.andi %2, %27 : vector<4x128xi32>
    %c1_i32_3 = arith.constant 1 : i32
    %29 = vector.broadcast %c1_i32_3 : i32 to vector<4x128xi32>
    %30 = arith.cmpi eq, %28, %29 : vector<4x128xi32>
    %31 = math.cos %26 : vector<4x128xf32>
    %32 = math.sin %26 : vector<4x128xf32>
    %33 = arith.select %30, %31, %32 : vector<4x128xi1>, vector<4x128xf32>
    %c0_4 = arith.constant 0 : index
    %c0_5 = arith.constant 0 : index
    %34 = vector.load %arg3[%c0_4, %c0_5] : memref<4x128xf32, #tpu.memory_space<vmem>>, vector<4x128xf32>
    tpu.vector_store %arg3[%c0_4, %c0_5], %33 {strides = array<i32>} : memref<4x128xf32, #tpu.memory_space<vmem>>, vector<4x128xf32>,
    return
  }
  func.func @transform_0(%arg0: i32) -> (i32, i32) {
    %c0_i32 = arith.constant 0 : i32
    %c0_i32_0 = arith.constant 0 : i32
    return %arg0, %c0_i32 : i32, i32
  }
  func.func @transform_1(%arg0: i32) -> (i32, i32) {
    %c0_i32 = arith.constant 0 : i32
    %c0_i32_0 = arith.constant 0 : i32
    %c0_i32_1 = arith.constant 0 : i32
    return %c0_i32, %c0_i32_0 : i32, i32
  }
  func.func @transform_2(%arg0: i32) -> (i32, i32) {
    %c0_i32 = arith.constant 0 : i32
    %c0_i32_0 = arith.constant 0 : i32
    return %arg0, %c0_i32 : i32, i32
  }
}

</mosaic_0001>

<bundles_post_ra>
// kernel: tpu_custom_call.1
= control target key start
LH: loop header
LB: loop body
LE: loop exit
PB: predicated region body
PF: predicated region fallthrough
CT: control target
= control target key end

     0   :  { %7 = vsyncpa [#allocation3], 0  ;;  %s432_s0 = inlined_call_operand.hbm [shape: s32[4,4], index: 0, kind: input, shape index: {}]   ;;  %s433_s1 = inlined_call_operand.vmem [shape: f32[1,128], index: 1, kind: input, shape index: {}]   ;;  %s434_s2 = inlined_call_operand.hbm [shape: f32[4,128], index: 2, kind: output, shape index: {}]  }
   0x1   :  { %8 = vsyncpa [#allocation4], 0  ;;  %s363_s9 = smov [#allocation2]  }
   0x2   :  { %s15_s10 = sshll.u32 %s363_s9, 4  ;;  %s16_s10 = int_to_ptr.vmem [resolvable:$true] %s15_s10 }
   0x3   :  { %s327_s11 = scalar_lea.vmem %s16_s10, 64  ;;  %p332_p1 = scmp.lt.s32.totalorder %s16_s10, %s16_s10 }
   0x4   :  { %p328_p0 = scmp.ne.s32.totalorder %s16_s10, %s327_s11  ;;  %p333_p2 = scmp.lt.s32.totalorder %s327_s11, %s327_s11 }
   0x6   :  { %p334_p3 = por %p333_p2, %p332_p1 }
   0x8   :  { %p335_p4 = pnand %p334_p3, %p328_p0 }
   0xa   :  { %338 = shalt.err (!%p335_p4)
}
   0xb   :  { %18 = dma.hbm_to_vmem [thread:$0]  %s432_s0, 64, %s16_s10, [#allocation3]  }
   0xc   :  { %359 = dma.done.wait [#allocation3], 64  }
   0xd   :  { %360 = vsyncadd [#allocation3], 4294967232  ;;  %v364_v0 = vmov 3   ;;  %v365_v1 = vmov 1   ;;  %v24_v2 = vld [vmem:[#allocation2] sm:$0xf]  ;;  %v26_v6 = vlaneseq }
   0xe   :  { %310 = vset.pattern.permute.xlu0 %v364_v0  ;;  %312 = vset.pattern.permute.xlu1 %v365_v1  ;;  %v25_v3 = vcvt.s32.f32 %v24_v2  ;;  %v366_v4 = vmov 2   ;;  %v367_v5 = vmov 0   ;;  %v285_v13 = vld [vmem:[%s433_s1] ss:$0 sm:$0xff]  ;;  %v368_v27 = vmov 683565275  }
   0xf   :  { %v393_v7 = vand.u32 127, %v26_v6  ;;  %v369_v29 = vmov 2475754826   ;;  %v370_v32 = vmov 2131351028   ;;  %s374_s1 = smov [#allocation5]  }
  0x10   :  { %30 = vperm.xlu0 %310, %v25_v3   ;;  %41 = vperm.xlu1 %312, %v25_v3   ;;  %v371_v35 = vmov 2102212464   ;;  %v372_v38 = vmov 920167782   ;;  %v373_v41 = vmov 1326507024  }
  0x11   :  { %vm33_vm0 = vcmp.lt.s32.totalorder %v393_v7, 96  ;;  %vm39_vm1 = vcmp.lt.s32.totalorder %v393_v7, 64  ;;  %vm45_vm2 = vcmp.lt.s32.totalorder %v393_v7, 32  ;;  %s276_s15 = sshll.u32 %s374_s1, 4  ;;  %s277_s15 = int_to_ptr.vmem [resolvable:$true] %s276_s15 }
  0x12   :  { %s339_s16 = scalar_lea.vmem %s277_s15, 64  ;;  %p344_p6 = scmp.lt.s32.totalorder %s277_s15, %s277_s15 }
  0x13   :  { %p340_p5 = scmp.ne.s32.totalorder %s277_s15, %s339_s16  ;;  %p345_p7 = scmp.lt.s32.totalorder %s339_s16, %s339_s16 }
  0x14   :  { %311 = vset.pattern.permute.xlu0 %v366_v4  ;;  %313 = vset.pattern.permute.xlu1 %v367_v5 }
  0x15   :  { %35 = vperm.xlu0 %311, %v25_v3   ;;  %47 = vperm.xlu1 %313, %v25_v3   ;;  %p346_p8 = por %p345_p7, %p344_p6 }
  0x17   :  { %p347_p9 = pnand %p346_p8, %p340_p5 }
  0x19   :  { %314 = vset.pattern.permute.xlu0 %v367_v5 }
  0x8b   :  { %v31_v8 = vpop.permute.xlu0 %30  ;;  %v42_v9 = vpop.permute.xlu1 %41 }
  0x90   :  { %v36_v10 = vpop.permute.xlu0 %35  ;;  %v48_v11 = vpop.permute.xlu1 %47 }
  0x91   :  { %v38_v12 = vsel %vm33_vm0, %v36_v10, %v31_v8 }
  0x92   :  { %v44_v14 = vsel %vm39_vm1, %v42_v9, %v38_v12 }
  0x93   :  { %v50_v15 = vsel %vm45_vm2, %v48_v11, %v44_v14 }
  0x94   :  { %v401_v16 = vmul.f32 %v285_v13, %v50_v15 }
  0x96   :  { %v64_v17 = vand.u32 2139095040, %v401_v16  ;;  %v61_v21 = vand.u32 2147483647, %v401_v16  ;;  %vm63_vm10 = vcmp.lt.s32.totalorder %v401_v16, 0 }
  0x98   :  { %v65_v18 = vshrl.u32 %v64_v17, 23  ;;  %v68_v24 = vand.u32 8388607, %v61_v21  ;;  %vm62_vm11 = vcmp.le.f32.partialorder %v61_v21, 0.7853982 }
  0x9a   :  { %v286_v19 = vadd.s32 4294967169, %v65_v18  ;;  %v69_v43 = vor.u32 8388608, %v68_v24 }
  0x9c   :  { %v71_v20 = vadd.s32 1, %v286_v19  ;;  %v109_v57 = vshll.u32 %v69_v43, 8 }
  0x9e   :  { %vm72_vm3 = vcmp.gt.s32.totalorder %v71_v20, 0 }
  0x9f   :  { %v73_v22 = vsel %vm72_vm3, %v71_v20, 0  ;;  %vm153_vm3 = vweird.f32 %v401_v16 }
  0xa0   :  { %v75_v23 = vand.u32 31, %v73_v22  ;;  %v74_v26 = vshrl.u32 %v73_v22, 5 }
  0xa2   :  { %v76_v25 = vsub.s32 32, %v75_v23  ;;  %v78_v28 = vshll.u32 %v368_v27, %v75_v23  ;;  %v81_v30 = vshll.u32 %v369_v29, %v75_v23  ;;  %v84_v34 = vshll.u32 %v370_v32, %v75_v23 }
  0xa3   :  { %v87_v37 = vshll.u32 %v371_v35, %v75_v23  ;;  %v90_v40 = vshll.u32 %v372_v38, %v75_v23  ;;  %vm93_vm4 = vcmp.lt.s32.totalorder %v74_v26, 1  ;;  %vm96_vm5 = vcmp.lt.s32.totalorder %v74_v26, 4 }
  0xa4   :  { %v79_v31 = vshrl.u32 %v369_v29, %v76_v25  ;;  %v82_v33 = vshrl.u32 %v370_v32, %v76_v25  ;;  %v85_v36 = vshrl.u32 %v371_v35, %v76_v25  ;;  %v88_v39 = vshrl.u32 %v372_v38, %v76_v25 }
  0xa5   :  { %v91_v42 = vshrl.u32 %v373_v41, %v76_v25  ;;  %v77_v52 = vshrl.u32 %v368_v27, %v76_v25  ;;  %vm95_vm6 = vcmp.lt.s32.totalorder %v74_v26, 3  ;;  %vm94_vm7 = vcmp.lt.s32.totalorder %v74_v26, 2 }
  0xa6   :  { %v80_v44 = vor.u32 %v79_v31, %v78_v28  ;;  %v83_v45 = vor.u32 %v82_v33, %v81_v30  ;;  %v86_v46 = vor.u32 %v85_v36, %v84_v34  ;;  %v89_v47 = vor.u32 %v88_v39, %v87_v37 }
  0xa7   :  { %v92_v48 = vor.u32 %v91_v42, %v90_v40  ;;  %v59_v38 = vand.u32 1, %v393_v7 }
  0xa8   :  { %v98_v49 = vsel %vm96_vm5, %v86_v46, 2102212464  ;;  %v101_v50 = vsel %vm93_vm4, %v80_v44, %v83_v45  ;;  %v105_v51 = vsel %vm93_vm4, %v83_v45, %v86_v46  ;;  %v102_v53 = vsel %vm96_vm5, %v89_v47, 920167782 }
  0xa9   :  { %v106_v54 = vsel %vm96_vm5, %v92_v48, 1326507024  ;;  %v103_v55 = vsel %vm95_vm6, %v86_v46, %v102_v53  ;;  %v97_v58 = vsel %vm93_vm4, %v77_v52, %v80_v44  ;;  %v99_v59 = vsel %vm95_vm6, %v83_v45, %v98_v49 }
  0xaa   :  { %v107_v56 = vsel %vm95_vm6, %v89_v47, %v106_v54  ;;  %v104_v60 = vsel %vm94_vm7, %v101_v50, %v103_v55  ;;  %v100_v2 = vsel %vm94_vm7, %v97_v58, %v99_v59  ;;  %vm422_vm12 = vcmp.eq.s32.totalorder %v59_v38, 1 }
  0xab   :  { %v108_v61 = vsel %vm94_vm7, %v105_v51, %v107_v56  ;;  %v410_v0 = vmul.u32.u64.low %v109_v57, %v104_v60  ;;  %v411_v1 = vmul.u32.u64.high %v109_v57, %v104_v60, %v410_v0  ;;  %v116_v4 = vmul.u32 %v109_v57, %v100_v2 }
  0xac   :  { %v407_v62 = vmul.u32.u64.low %v109_v57, %v108_v61  ;;  %v408_v63 = vmul.u32.u64.high %v109_v57, %v108_v61, %v407_v62 }
  0xad   :  { %v119_v3 = vadd.s32 1, %v411_v1 }
  0xae   :  { %vm118_vm8 = vc.u32 %v408_v63, %v410_v0  ;;  %v117_v18 = vadd.s32 %v410_v0, %v408_v63 }
  0xaf   :  { %v120_v5 = vsel %vm118_vm8, %v119_v3, %v411_v1 }
  0xb0   :  { %v121_v6 = vadd.s32 %v120_v5, %v116_v4 }
  0xb2   :  { %v122_v8 = vadd.s32 536870912, %v121_v6 }
  0xb4   :  { %v123_v9 = vshrl.u32 %v122_v8, 30 }
  0xb6   :  { %v124_v10 = vshll.u32 %v123_v9, 30  ;;  %v147_v32 = vsub.s32 4, %v123_v9 }
  0xb8   :  { %v125_v11 = vsub.s32 %v121_v6, %v124_v10  ;;  %v148_v35 = vsel %vm63_vm10, %v147_v32, %v123_v9 }
  0xb9   :  { %v150_v36 = vsel %vm62_vm11, 0, %v148_v35 }
  0xba   :  { %v127_v12 = vsub.s32 0, %v125_v11  ;;  %v257_v37 = vadd.s32 3, %v150_v36  ;;  %v154_v39 = vand.u32 3, %v150_v36 }
  0xbc   :  { %v287_v13 = vmin.u32 %v127_v12, %v125_v11  ;;  %v258_v40 = vand.u32 3, %v257_v37  ;;  %vm159_vm13 = vcmp.eq.s32.totalorder %v154_v39, 2  ;;  %vm156_vm15 = vcmp.eq.s32.totalorder %v154_v39, 0 }
  0xbd   :  { %vm155_vm1 = vcmp.lt.s32.totalorder %v154_v39, 2 }
  0xbe   :  { %v129_v14 = vclz %v287_v13  ;;  %vm263_vm14 = vcmp.eq.s32.totalorder %v258_v40, 2  ;;  %vm260_vm0 = vcmp.eq.s32.totalorder %v258_v40, 0  ;;  %vm259_vm2 = vcmp.lt.s32.totalorder %v258_v40, 2 }
  0xc0   :  { %v288_v15 = vadd.s32 4294967294, %v129_v14 }
  0xc2   :  { %vm289_vm9 = vcmp.lt.s32.totalorder %v288_v15, 0 }
  0xc3   :  { %v132_v17 = vsel %vm289_vm9, 0, %v288_v15 }
  0xc4   :  { %v133_v19 = vsub.s32 32, %v132_v17  ;;  %v137_v20 = vsub.s32 4294967266, %v132_v17  ;;  %v134_v22 = vshll.u32 %v125_v11, %v132_v17 }
  0xc6   :  { %v135_v23 = vshrl.u32 %v117_v18, %v133_v19  ;;  %v138_v24 = vadd.s32 127, %v137_v20 }
  0xc8   :  { %v136_v25 = vor.u32 %v135_v23, %v134_v22  ;;  %v139_v26 = vshll.u32 %v138_v24, 23 }
  0xca   :  { %v140_v27 = vor.u32 4788187, %v139_v26  ;;  %v143_v29 = vcvt.s32.f32 %v136_v25 }
  0xcc   :  { %v141_v28 = vand.u32 2147483647, %v140_v27 }
  0xce   :  { %v144_v30 = vmul.f32 %v143_v29, %v141_v28 }
  0xd0   :  { %v145_v31 = vxor.u32 2147483648, %v144_v30 }
  0xd2   :  { %v146_v33 = vsel %vm63_vm10, %v145_v31, %v144_v30 }
  0xd3   :  { %v149_v34 = vsel %vm62_vm11, %v401_v16, %v146_v33 }
  0xd4   :  { %315 = vcosq.f32 %v149_v34 }
  0xd5   :  { %317 = vsinq.f32 %v149_v34 }
  0xe1   :  { %v316_v41 = vpop.eup %315 }
  0xe2   :  { %v318_v42 = vpop.eup %317  ;;  %v160_v43 = vxor.u32 2147483648, %v316_v41 }
  0xe3   :  { %v157_v45 = vxor.u32 2147483648, %v318_v42 }
  0xe4   :  { %v161_v21 = vsel %vm159_vm13, %v160_v43, %v318_v42  ;;  %v265_v46 = vsel %vm263_vm14, %v160_v43, %v318_v42 }
  0xe5   :  { %v158_v7 = vsel %vm156_vm15, %v316_v41, %v157_v45  ;;  %v262_v47 = vsel %vm260_vm0, %v316_v41, %v157_v45 }
  0xe6   :  { %v162_v48 = vsel %vm155_vm1, %v158_v7, %v161_v21  ;;  %v266_v49 = vsel %vm259_vm2, %v262_v47, %v265_v46 }
  0xe7   :  { %v163_v50 = vsel %vm153_vm3, nan, %v162_v48  ;;  %v267_v51 = vsel %vm153_vm3, nan, %v266_v49 }
  0xe8   :  { %v268_v52 = vsel %vm422_vm12, %v163_v50, %v267_v51 }
  0xe9   :  { %269 = vst [vmem:[#allocation5] sm:$0xf] %v268_v52 }
  0xea   :  { %350 = shalt.err (!%p347_p9)
}
  0xeb   :  { %279 = dma.vmem_to_hbm [thread:$0]  %s277_s15, 64, %s434_s2, [#allocation4]  }
  0xec   :  { %361 = dma.done.wait [#allocation4], 64  }
  0xed   :  { %362 = vsyncadd [#allocation4], 4294967232 }
  0xee   :  { %283 = vsyncpa [#allocation3], 1 }
  0xef   :  { %284 = vsyncpa [#allocation4], 1 }

</bundles_post_ra>
